<compile_context>
chip_gen: v7x
topology: tpu7x:2x2x1
jax: 0.10.0
libtpu: 0.0.40
codegen_flags: <defaults>
</compile_context>

<pallas_src>
import jax
import jax.numpy as jnp
from jax.experimental import pallas as pl
from jax.experimental.pallas import tpu as pltpu


def _round_up(x, m):
    return ((x + m - 1) // m) * m


def _ceil_div(a, b):
    return -(-a // b)


def _vmem_capacity_bytes():
    try:
        return int(pltpu.get_tpu_info().vmem_capacity_bytes)
    except Exception:
        return 64 << 20  # conservative fallback: v7x physical VMEM


# ----------------------------- Pallas kernels --------------------------------

def _mm_resident_kernel(p_ref, w_ref, scale_ref, shift_ref, o_ref):
    # p_ref:     (tm, K_pad)  bf16 im2col patches tile
    # w_ref:     (K_pad, tn)  bf16 conv weight tile (resident across M tiles)
    # scale_ref: (1, tn)      f32  BN scale = gamma / sqrt(var + eps)
    # shift_ref: (1, tn)      f32  BN shift = beta - mean * scale
    # o_ref:     (tm, tn)     f32  output tile (lane-dense)
    acc = jnp.dot(p_ref[...], w_ref[...], preferred_element_type=jnp.float32)
    o_ref[...] = jnp.maximum(acc * scale_ref[...] + shift_ref[...], 0.0)


def _mm_ksplit_kernel(p_ref, w_ref, scale_ref, shift_ref, o_ref):
    # K-reduction path: accumulate directly into the resident f32 output block
    # (its index_map ignores k), then apply scale/shift + ReLU in place.
    k = pl.program_id(2)

    @pl.when(k == 0)
    def _():
        o_ref[...] = jnp.zeros_like(o_ref)

    o_ref[...] += jnp.dot(p_ref[...], w_ref[...],
                          preferred_element_type=jnp.float32)

    @pl.when(k == pl.num_programs(2) - 1)
    def _():
        o_ref[...] = jnp.maximum(
            o_ref[...] * scale_ref[...] + shift_ref[...], 0.0)


# ------------------------------ kernel wrapper --------------------------------

def _pallas_conv_matmul(patches_bf16, w_bf16, scale_f32, shift_f32,
                        force_k_split=False):
    """patches (M, K) bf16, weight (K, Cout) bf16, scale/shift (Cout,) f32
       -> (M, Cout) f32 of relu((patches @ w) * scale + shift)."""
    M, K = patches_bf16.shape
    Cout = w_bf16.shape[1]

    vmem_cap = _vmem_capacity_bytes()
    budget = (vmem_cap * 3) // 4  # leave headroom for compiler-internal scratch

    # Lane-dense padding (unmasked MXU operands / stores).  Prefer 256 alignment
    # (v6e/v7x 256-wide MXU) when the extra padding is cheap (<~13%).
    def _pad_dim(d):
        p = _round_up(d, 128)
        p256 = _round_up(d, 256)
        if p % 256 != 0 and p256 <= int(p * 1.13):
            p = p256
        return p

    K_pad = _pad_dim(K)
    Cout_pad = _pad_dim(Cout)

    # Cout tile (only matters for very wide layers; keeps v7x within VMEM).
    if Cout_pad <= 512:
        tn = Cout_pad
    elif Cout_pad % 512 == 0:
        tn = 512
    elif Cout_pad % 256 == 0:
        tn = 256
    else:
        tn = 128

    # Row tile: multiple of 16 (bf16 sublane packing); at least 2 M tiles so
    # both v7x TensorCores get work; larger cap when VMEM allows (v5e/v6e).
    tm_cap = 1024 if vmem_cap >= (100 << 20) else 512
    if M > 16:
        n_m_tiles = max(2, _ceil_div(M, tm_cap))
        tm = min(tm_cap, _round_up(_ceil_div(M, n_m_tiles), 16))
    else:
        tm = _round_up(max(M, 8), 16)
    M_pad = _round_up(M, tm)

    # Single pad per array, on bf16 data (no f32 intermediate copies).
    patches = jnp.pad(patches_bf16, ((0, M_pad - M), (0, K_pad - K)))
    w = jnp.pad(w_bf16, ((0, K_pad - K), (0, Cout_pad - Cout)))
    scale = jnp.pad(scale_f32.reshape(1, Cout).astype(jnp.float32),
                    ((0, 0), (0, Cout_pad - Cout)))
    shift = jnp.pad(shift_f32.reshape(1, Cout).astype(jnp.float32),
                    ((0, 0), (0, Cout_pad - Cout)))

    # Path selection: keep the whole (K_pad, tn) weight resident in VMEM when it
    # fits; otherwise split K and accumulate into the resident output block.
    est_resident = (2 * tm * K_pad * 2        # patches tiles (bf16, 2x buffered)
                    + 2 * K_pad * tn * 2      # weight tile (bf16)
                    + 2 * tm * tn * 4         # output tiles (f32, 2x buffered)
                    + 4 * tn * 4)             # scale + shift
    use_resident = (not force_k_split) and (
        int(est_resident * 1.25) + (2 << 20) <= budget)

    if use_resident:
        # Cout axis outermost -> weight block index constant across all M tiles,
        # so the weight is DMA'd from HBM only once per Cout tile.
        grid = (Cout_pad // tn, M_pad // tm)
        vmem_limit = int(min(max(int(est_resident * 1.25) + (2 << 20), 16 << 20),
                             budget))
        out = pl.pallas_call(
            _mm_resident_kernel,
            out_shape=jax.ShapeDtypeStruct((M_pad, Cout_pad), jnp.float32),
            grid_spec=pltpu.PrefetchScalarGridSpec(
                num_scalar_prefetch=0,
                grid=grid,
                in_specs=[
                    pl.BlockSpec((tm, K_pad), lambda j, i: (i, 0)),
                    pl.BlockSpec((K_pad, tn), lambda j, i: (0, j)),
                    pl.BlockSpec((1, tn), lambda j, i: (0, j)),
                    pl.BlockSpec((1, tn), lambda j, i: (0, j)),
                ],
                out_specs=pl.BlockSpec((tm, tn), lambda j, i: (i, j)),
            ),
            compiler_params=pltpu.CompilerParams(
                dimension_semantics=("parallel", "parallel"),
                vmem_limit_bytes=vmem_limit),
        )(patches, w, scale, shift)
    else:
        if K_pad % 512 == 0:
            tk = 512
        elif K_pad % 256 == 0:
            tk = 256
        else:
            tk = 128
        grid = (M_pad // tm, Cout_pad // tn, K_pad // tk)
        est = (2 * tm * tk * 2 + 2 * tk * tn * 2 + 2 * tm * tn * 4 + 4 * tn * 4)
        vmem_limit = int(min(max(int(est * 1.25) + (2 << 20), 16 << 20), budget))
        out = pl.pallas_call(
            _mm_ksplit_kernel,
            out_shape=jax.ShapeDtypeStruct((M_pad, Cout_pad), jnp.float32),
            grid_spec=pltpu.PrefetchScalarGridSpec(
                num_scalar_prefetch=0,
                grid=grid,
                in_specs=[
                    pl.BlockSpec((tm, tk), lambda i, j, k: (i, k)),
                    pl.BlockSpec((tk, tn), lambda i, j, k: (k, j)),
                    pl.BlockSpec((1, tn), lambda i, j, k: (0, j)),
                    pl.BlockSpec((1, tn), lambda i, j, k: (0, j)),
                ],
                out_specs=pl.BlockSpec((tm, tn), lambda i, j, k: (i, j)),
            ),
            compiler_params=pltpu.CompilerParams(
                dimension_semantics=("parallel", "parallel", "arbitrary"),
                vmem_limit_bytes=vmem_limit),
        )(patches, w, scale, shift)

    if M_pad == M and Cout_pad == Cout:
        return out
    return out[:M, :Cout]


# ------------------------------- glue (JAX) ----------------------------------

def _im2col_nchw(x, kh, kw, stride, padding, dilation, dtype=jnp.bfloat16):
    """x: (N, C, H, W) -> patches (N*OH*OW, C*kh*kw) in `dtype`, columns ordered
    C-major then (kh, kw), matching an OIHW weight flattened as (Cout, Cin*kh*kw)."""
    N, C, H, W = x.shape
    xp = jnp.pad(x.astype(dtype),
                 ((0, 0), (0, 0), (padding, padding), (padding, padding)))
    OH = (H + 2 * padding - dilation * (kh - 1) - 1) // stride + 1
    OW = (W + 2 * padding - dilation * (kw - 1) - 1) // stride + 1
    cols = []
    for i in range(kh):
        for j in range(kw):
            r0 = i * dilation
            c0 = j * dilation
            patch = xp[:, :,
                       r0: r0 + stride * (OH - 1) + 1: stride,
                       c0: c0 + stride * (OW - 1) + 1: stride]  # (N, C, OH, OW)
            cols.append(patch)
    col = jnp.stack(cols, axis=2)                 # (N, C, kh*kw, OH, OW)
    col = col.transpose(0, 3, 4, 1, 2)            # (N, OH, OW, C, kh*kw)
    col = col.reshape(N * OH * OW, C * kh * kw)   # rows: pixels, cols: Cin*kh*kw
    return col, OH, OW


class ConvBNReLUPallas:
    """Conv2d(bias=False) + BatchNorm2d(eval, running stats) + ReLU.

    SynchronizedBatchNorm2d in eval / non-parallel mode reduces to standard
    F.batch_norm with running statistics, so it folds into a per-channel
    scale/shift applied to the conv output.
    """

    def __init__(self, c_in, c_out, kernel_size, stride, padding, dilation,
                 key, eps=1e-5, force_k_split=False):
        self.c_in, self.c_out = c_in, c_out
        self.kh = self.kw = kernel_size
        self.stride, self.padding, self.dilation = stride, padding, dilation
        self.eps = eps
        self.force_k_split = force_k_split

        k_w, k_g, k_b, k_m, k_v = jax.random.split(key, 5)
        # Conv weight: (C_out, C_in, kh, kw), no bias (nn.Conv2d(bias=False)).
        self.weight = jax.random.normal(
            k_w, (c_out, c_in, self.kh, self.kw), jnp.float32) * 0.1
        # BN affine params / running stats.
        self.gamma = 1.0 + 0.1 * jax.random.normal(k_g, (c_out,), jnp.float32)
        self.beta = 0.1 * jax.random.normal(k_b, (c_out,), jnp.float32)
        self.running_mean = 0.1 * jax.random.normal(k_m, (c_out,), jnp.float32)
        self.running_var = jnp.abs(
            1.0 + 0.1 * jax.random.normal(k_v, (c_out,), jnp.float32))

    def __call__(self, x):
        # x: (N, C_in, H, W) float32
        N, C, H, W = x.shape
        assert C == self.c_in
        patches, OH, OW = _im2col_nchw(
            x, self.kh, self.kw, self.stride, self.padding, self.dilation)
        # Flatten weight to (C_in*kh*kw, C_out) bf16; same (C, kh, kw) ordering
        # as the patch columns.  BN scale stays in the f32 epilogue.
        w_flat = self.weight.reshape(
            self.c_out, self.c_in * self.kh * self.kw).T.astype(jnp.bfloat16)
        scale = self.gamma / jnp.sqrt(self.running_var + self.eps)   # (C_out,)
        shift = self.beta - self.running_mean * scale                # (C_out,)

        out = _pallas_conv_matmul(patches, w_flat, scale, shift,
                                  force_k_split=self.force_k_split)  # (M, C_out)
        # (N*OH*OW, C_out) -> (N, C_out, OH, OW)
        # TODO(synk): keep NHWC (and bf16) when chaining ConvBNReLU layers to
        #             avoid this extra HBM transpose pass.
        return out.reshape(N, OH, OW, self.c_out).transpose(0, 3, 1, 2)


# ------------------------------ reference ------------------------------------

def _reference(module, x):
    y = jax.lax.conv_general_dilated(
        x, module.weight,
        window_strides=(module.stride, module.stride),
        padding=[(module.padding, module.padding)] * 2,
        rhs_dilation=(module.dilation, module.dilation),
        dimension_numbers=("NCHW", "OIHW", "NCHW"))
    mean = module.running_mean.reshape(1, -1, 1, 1)
    var = module.running_var.reshape(1, -1, 1, 1)
    g = module.gamma.reshape(1, -1, 1, 1)
    b = module.beta.reshape(1, -1, 1, 1)
    y = (y - mean) / jnp.sqrt(var + module.eps) * g + b
    return jnp.maximum(y, 0.0)


# --------------------------------- main ---------------------------------------

if __name__ == "__main__":
    key = jax.random.PRNGKey(0)
    k_x, k_p, k_x2, k_p2 = jax.random.split(key, 4)

    # Test 1: typical small ConvBNReLU (weight-resident path, 2 M tiles).
    x = jax.random.normal(k_x, (2, 4, 16, 16), jnp.float32)
    module = ConvBNReLUPallas(c_in=4, c_out=8, kernel_size=3, stride=1,
                              padding=1, dilation=1, key=k_p)
    out = jax.block_until_ready(jax.jit(lambda inp: module(inp))(x))
    ref = jax.block_until_ready(_reference(module, x))
    assert out.shape == (2, 8, 16, 16), out.shape
    # Tolerance accounts for bf16 MXU operands (f32 accumulation) vs f32 reference.
    assert jnp.allclose(out, ref, atol=3e-2, rtol=3e-2), (
        float(jnp.max(jnp.abs(out - ref))))

    # Test 2: force the K-split path (multiple M and K tiles, accumulate into
    # the resident output block) to validate the reduction/revisiting path.
    x2 = jax.random.normal(k_x2, (2, 32, 16, 16), jnp.float32)
    module2 = ConvBNReLUPallas(c_in=32, c_out=8, kernel_size=3, stride=1,
                               padding=1, dilation=1, key=k_p2,
                               force_k_split=True)
    out2 = jax.block_until_ready(jax.jit(lambda inp: module2(inp))(x2))
    ref2 = jax.block_until_ready(_reference(module2, x2))
    assert out2.shape == (2, 8, 16, 16), out2.shape
    assert jnp.allclose(out2, ref2, atol=3e-2, rtol=3e-2), (
        float(jnp.max(jnp.abs(out2 - ref2))))

    print("KERNEL_OK")
</pallas_src>

<mosaic_0001>
module attributes {stable_mosaic.version = 11 : i64} {
  func.func @_mm_resident_kernel(%arg0: i32, %arg1: i32, %arg2: memref<256x128xbf16, #tpu.memory_space<vmem>>, %arg3: memref<128x128xbf16, #tpu.memory_space<vmem>>, %arg4: memref<1x128xf32, #tpu.memory_space<vmem>>, %arg5: memref<1x128xf32, #tpu.memory_space<vmem>>, %arg6: memref<256x128xf32, #tpu.memory_space<vmem>>) attributes {dimension_semantics = [#tpu.dimension_semantics<parallel>, #tpu.dimension_semantics<parallel>], iteration_bounds = array<i64: 1, 2>, scalar_prefetch = 0 : i64, scratch_operands = 0 : i64, tpu.core_type = #tpu.core_type<tc>, window_params = [{transform_indices = @transform_0, window_bounds = array<i64: 256, 128>}, {transform_indices = @transform_1, window_bounds = array<i64: 128, 128>}, {transform_indices = @transform_2, window_bounds = array<i64: 1, 128>}, {transform_indices = @transform_3, window_bounds = array<i64: 1, 128>}, {transform_indices = @transform_4, window_bounds = array<i64: 256, 128>}]} {
    %c0 = arith.constant 0 : index
    %c0_0 = arith.constant 0 : index
    %0 = vector.load %arg2[%c0, %c0_0] : memref<256x128xbf16, #tpu.memory_space<vmem>>, vector<256x128xbf16>
    %c0_1 = arith.constant 0 : index
    %c0_2 = arith.constant 0 : index
    %1 = vector.load %arg3[%c0_1, %c0_2] : memref<128x128xbf16, #tpu.memory_space<vmem>>, vector<128x128xbf16>
    %cst = arith.constant dense<0.000000e+00> : vector<256x128xf32>
    %2 = tpu.matmul %0, %1, %cst {dimension_numbers = #tpu.dot_dimension_numbers<[1], [0], [0], [1], [0, 0, 1, 1], [], []>} : vector<256x128xbf16>, vector<128x128xbf16>, vector<256x128xf32> -> vector<256x128xf32>
    %c0_3 = arith.constant 0 : index
    %c0_4 = arith.constant 0 : index
    %3 = vector.load %arg4[%c0_3, %c0_4] : memref<1x128xf32, #tpu.memory_space<vmem>>, vector<1x128xf32>
    %4 = vector.broadcast %3 : vector<1x128xf32> to vector<256x128xf32>
    %5 = arith.mulf %2, %4 : vector<256x128xf32>
    %c0_5 = arith.constant 0 : index
    %c0_6 = arith.constant 0 : index
    %6 = vector.load %arg5[%c0_5, %c0_6] : memref<1x128xf32, #tpu.memory_space<vmem>>, vector<1x128xf32>
    %7 = vector.broadcast %6 : vector<1x128xf32> to vector<256x128xf32>
    %8 = arith.addf %5, %7 : vector<256x128xf32>
    %cst_7 = arith.constant 0.000000e+00 : f32
    %9 = vector.broadcast %cst_7 : f32 to vector<256x128xf32>
    %10 = arith.maximumf %8, %9 : vector<256x128xf32>
    %c0_8 = arith.constant 0 : index
    %c0_9 = arith.constant 0 : index
    %11 = vector.load %arg6[%c0_8, %c0_9] : memref<256x128xf32, #tpu.memory_space<vmem>>, vector<256x128xf32>
    tpu.vector_store %arg6[%c0_8, %c0_9], %10 {strides = array<i32>} : memref<256x128xf32, #tpu.memory_space<vmem>>, vector<256x128xf32>,
    return
  }
  func.func @transform_0(%arg0: i32, %arg1: i32) -> (i32, i32) {
    %c0_i32 = arith.constant 0 : i32
    %c0_i32_0 = arith.constant 0 : i32
    return %arg1, %c0_i32 : i32, i32
  }
  func.func @transform_1(%arg0: i32, %arg1: i32) -> (i32, i32) {
    %c0_i32 = arith.constant 0 : i32
    %c0_i32_0 = arith.constant 0 : i32
    return %c0_i32, %arg0 : i32, i32
  }
  func.func @transform_2(%arg0: i32, %arg1: i32) -> (i32, i32) {
    %c0_i32 = arith.constant 0 : i32
    %c0_i32_0 = arith.constant 0 : i32
    return %c0_i32, %arg0 : i32, i32
  }
  func.func @transform_3(%arg0: i32, %arg1: i32) -> (i32, i32) {
    %c0_i32 = arith.constant 0 : i32
    %c0_i32_0 = arith.constant 0 : i32
    return %c0_i32, %arg0 : i32, i32
  }
  func.func @transform_4(%arg0: i32, %arg1: i32) -> (i32, i32) {
    %c0_i32 = arith.constant 0 : i32
    return %arg1, %arg0 : i32, i32
  }
}

</mosaic_0001>

<bundles_post_ra>
// kernel: _lambda_.1
= control target key start
LH: loop header
LB: loop body
LE: loop exit
PB: predicated region body
PF: predicated region fallthrough
CT: control target
= control target key end

     0   :  { %s1101_s15 = smov 0   ;;  %s1103_s16 = smov 0   ;;  %s1288_s0 = inlined_call_operand.vmem [shape: bf16[512,128], index: 0, kind: input, shape index: {}]   ;;  %s1289_s1 = inlined_call_operand.vmem [shape: bf16[128,128], index: 1, kind: input, shape index: {}]   ;;  %s1290_s2 = inlined_call_operand.vmem [shape: f32[1,128], index: 2, kind: input, shape index: {}]   ;;  %s1291_s3 = inlined_call_operand.vmem [shape: f32[1,128], index: 3, kind: input, shape index: {}]   ;;  %s1292_s4 = inlined_call_operand.vmem [shape: f32[512,128], index: 4, kind: output, shape index: {}]  }
   0x1   :  { %s1105_s17 = smov 0  }
   0x2 LB: > { %s23_s18 = sadd.s32 1, %s1070_s16  ;;  %p883_p0 = scmp.ge.s32.totalorder %s1074_s17, 1  ;;  %s1074_s17 = sphi %s1105_s17, %s14_s17   ;;  %s1070_s16 = sphi %s1103_s16, %s1294_s16   ;;  %s1066_s15 = sphi %s1101_s15, %s1293_s15  }
   0x3   : > { %p24_p1 = scmp.ge.s32.totalorder %s23_s18, 2  ;;  %p202_p2 = scmp.lt.s32.totalorder %s1074_s17, 3 }
   0x5   : > { %s1296_s18 = smov (%p24_p1, %s23_s18), 0  ;;  %p203_p3 = pnand %p883_p0, %p202_p2 }
   0x6   : > { %v1028_v0 = vld [vmem:[%s1289_s1] sm:$0xff] (!%p203_p3)   ;;  %s884_s21 = sshll.u32 (!%p203_p3), %s1066_s15, 5  ;;  %v1029_v1 = vld [vmem:[%s1289_s1 + $0x8] sm:$0xff] (!%p203_p3)   ;;  %v1030_v2 = vld [vmem:[%s1289_s1 + $0x10] sm:$0xff] (!%p203_p3)  }
   0x7   : > { %206 = sbr.rel (%p203_p3) target bundleno = 285 (0x11d), region = 36  ;;  %p242_p4 = scmp.lt.s32.totalorder (!%p203_p3), %s884_s21, 63  ;;  %940 = vmatprep.subr.bf16.mxu0 (!%p203_p3), %v1028_v0  ;;  %988 = vmatprep.subr.bf16.mxu1 (!%p203_p3), %v1028_v0  ;;  %v1031_v3 = vld [vmem:[%s1289_s1 + $0x18] sm:$0xff] (!%p203_p3)   ;;  %v1032_v6 = vld [vmem:[%s1289_s1 + $0x20] sm:$0xff] (!%p203_p3)   ;;  %v1033_v7 = vld [vmem:[%s1289_s1 + $0x28] sm:$0xff] (!%p203_p3)  }
   0x8   : > { %941 = vmatpush3.bf16.msra.mxu0 (!%p203_p3), %v1028_v0  ;;  %996 = vmatpush3.bf16.msra.mxu1 (!%p203_p3), %v1028_v0  ;;  %v1034_v8 = vld [vmem:[%s1289_s1 + $0x30] sm:$0xff] (!%p203_p3)   ;;  %v1035_v9 = vld [vmem:[%s1289_s1 + $0x38] sm:$0xff] (!%p203_p3)   ;;  %v1170_v24 = vld [vmem:[%s1290_s2] ss:$0 sm:$0xff] (!%p203_p3) }
   0x9   : > { %942 = vmatprep.subr.bf16.mxu0 (!%p203_p3), %v1029_v1  ;;  %989 = vmatprep.subr.bf16.mxu1 (!%p203_p3), %v1029_v1  ;;  %v1175_v26 = vld [vmem:[%s1291_s3] ss:$0 sm:$0xff] (!%p203_p3) }
   0xc   : > { %943 = vmatpush3.bf16.msra.mxu0 (!%p203_p3), %v1029_v1  ;;  %997 = vmatpush3.bf16.msra.mxu1 (!%p203_p3), %v1029_v1 }
   0xd   : > { %944 = vmatprep.subr.bf16.mxu0 (!%p203_p3), %v1030_v2  ;;  %990 = vmatprep.subr.bf16.mxu1 (!%p203_p3), %v1030_v2 }
   0xe   : > { %s1298_s21 = smov (!%p242_p4, %s884_s21), 63 }
   0xf   : > { %s885_s26 = sshll.u32 %s1298_s21, 2  ;;  %s887_s22 = sshll.u32 %s1298_s21, 3 }
  0x10   : > { %s1134_s29 = scalar_lea.vmem %s1288_s0, %s885_s26  ;;  %945 = vmatpush3.bf16.msra.mxu0 %v1030_v2  ;;  %998 = vmatpush3.bf16.msra.mxu1 %v1030_v2  ;;  %s1189_s24 = scalar_lea.vmem %s1292_s4, %s887_s22 }
  0x11   : > { %v1036_v4 = vld [vmem:[%s1134_s29] sm:$0xff]   ;;  %946 = vmatprep.subr.bf16.mxu0 %v1031_v3  ;;  %991 = vmatprep.subr.bf16.mxu1 %v1031_v3  ;;  %v1038_v10 = vld [vmem:[%s1134_s29 + $0x8] sm:$0xff]   ;;  %v1040_v12 = vld [vmem:[%s1134_s29 + $0x10] sm:$0xff]  }
  0x12   : > { %v1037_v5 = vld [vmem:[%s1134_s29 + $0x40] sm:$0xff]   ;;  %956 = vmatprep.mubr.bf16.mxu0 %v1036_v4  ;;  %v1039_v11 = vld [vmem:[%s1134_s29 + $0x48] sm:$0xff]   ;;  %v1041_v13 = vld [vmem:[%s1134_s29 + $0x50] sm:$0xff]  }
  0x13   : > { %972 = vmatprep.mubr.bf16.mxu1 %v1037_v5  ;;  %v1042_v14 = vld [vmem:[%s1134_s29 + $0x18] sm:$0xff]   ;;  %v1044_v16 = vld [vmem:[%s1134_s29 + $0x20] sm:$0xff]   ;;  %v1046_v18 = vld [vmem:[%s1134_s29 + $0x28] sm:$0xff]  }
  0x14   : > { %947 = vmatpush3.bf16.msra.mxu0 %v1031_v3  ;;  %999 = vmatpush3.bf16.msra.mxu1 %v1031_v3  ;;  %v1043_v15 = vld [vmem:[%s1134_s29 + $0x58] sm:$0xff]   ;;  %v1045_v17 = vld [vmem:[%s1134_s29 + $0x60] sm:$0xff]   ;;  %v1047_v19 = vld [vmem:[%s1134_s29 + $0x68] sm:$0xff]  }
  0x15   : > { %948 = vmatprep.subr.bf16.mxu0 %v1032_v6  ;;  %992 = vmatprep.subr.bf16.mxu1 %v1032_v6  ;;  %v1048_v20 = vld [vmem:[%s1134_s29 + $0x30] sm:$0xff]   ;;  %v1050_v22 = vld [vmem:[%s1134_s29 + $0x38] sm:$0xff]  }
  0x16   : > { %v1049_v21 = vld [vmem:[%s1134_s29 + $0x70] sm:$0xff]   ;;  %v1051_v23 = vld [vmem:[%s1134_s29 + $0x78] sm:$0xff]  }
  0x18   : > { %949 = vmatpush3.bf16.msra.mxu0 %v1032_v6  ;;  %1000 = vmatpush3.bf16.msra.mxu1 %v1032_v6 }
  0x19   : > { %950 = vmatprep.subr.bf16.mxu0 %v1033_v7  ;;  %993 = vmatprep.subr.bf16.mxu1 %v1033_v7 }
  0x1c   : > { %951 = vmatpush3.bf16.msra.mxu0 %v1033_v7  ;;  %1001 = vmatpush3.bf16.msra.mxu1 %v1033_v7 }
  0x1d   : > { %952 = vmatprep.subr.bf16.mxu0 %v1034_v8  ;;  %994 = vmatprep.subr.bf16.mxu1 %v1034_v8 }
  0x20   : > { %953 = vmatpush3.bf16.msra.mxu0 %v1034_v8  ;;  %1002 = vmatpush3.bf16.msra.mxu1 %v1034_v8 }
  0x21   : > { %954 = vmatprep.subr.bf16.mxu0 %v1035_v9  ;;  %995 = vmatprep.subr.bf16.mxu1 %v1035_v9 }
  0x24   : > { %955 = vmatpush3.bf16.msra.mxu0 %v1035_v9  ;;  %1003 = vmatpush3.bf16.msra.mxu1 %v1035_v9 }
  0x27   : > { %957 = vmatmul.mubr.bf16.vlgmr.msra.gmra.mrb[0].mxu0 %v1038_v10  ;;  %973 = vmatmul.mubr.bf16.vlgmr.msra.gmra.mrb[0].mxu1 %v1039_v11 }
  0x28   : > { %960 = vmatprep.mubr.bf16.mxu0 %v1040_v12  ;;  %976 = vmatprep.mubr.bf16.mxu1 %v1041_v13 }
  0x2f   : > { %961 = vmatmul.mubr.bf16.gmra.mrb[4].mxu0 %v1042_v14  ;;  %977 = vmatmul.mubr.bf16.gmra.mrb[4].mxu1 %v1043_v15 }
  0x30   : > { %964 = vmatprep.mubr.bf16.mxu0 %v1044_v16  ;;  %980 = vmatprep.mubr.bf16.mxu1 %v1045_v17 }
  0x37   : > { %965 = vmatmul.mubr.bf16.gmra.mrb[8].mxu0 %v1046_v18  ;;  %981 = vmatmul.mubr.bf16.gmra.mrb[8].mxu1 %v1047_v19 }
  0x38   : > { %968 = vmatprep.mubr.bf16.mxu0 %v1048_v20  ;;  %984 = vmatprep.mubr.bf16.mxu1 %v1049_v21 }
  0x3f   : > { %969 = vmatmul.mubr.bf16.gmra.mrb[12].mxu0 %v1050_v22  ;;  %985 = vmatmul.mubr.bf16.gmra.mrb[12].mxu1 %v1051_v23 }
  0xfa   : > { %v958_v25 = vpop.f32.mrb[0].mxu0  ;;  %v974_v27 = vpop.f32.mrb[0].mxu1 }
  0xfb   : > { %v629_v28 = vmul.f32 %v958_v25, %v1170_v24  ;;  %v645_v29 = vmul.f32 %v974_v27, %v1170_v24  ;;  %v493_v30 = vpop.f32.mrb[1].mxu0  ;;  %v557_v31 = vpop.f32.mrb[1].mxu1 }
  0xfc   : > { %v627_v32 = vmul.f32 %v1170_v24, %v493_v30  ;;  %v643_v33 = vmul.f32 %v1170_v24, %v557_v31  ;;  %v959_v34 = vpop.f32.mrb[2].mxu0  ;;  %v975_v35 = vpop.f32.mrb[2].mxu1 }
  0xfd   : > { %v668_v36 = vadd.f32 %v1175_v26, %v629_v28  ;;  %v684_v37 = vadd.f32 %v1175_v26, %v645_v29  ;;  %v630_v38 = vmul.f32 %v959_v34, %v1170_v24  ;;  %v646_v39 = vmul.f32 %v975_v35, %v1170_v24  ;;  %v496_v40 = vpop.f32.mrb[3].mxu0  ;;  %v560_v41 = vpop.f32.mrb[3].mxu1 }
  0xfe   : > { %v666_v42 = vadd.f32 %v1175_v26, %v627_v32  ;;  %v682_v43 = vadd.f32 %v1175_v26, %v643_v33  ;;  %v628_v44 = vmul.f32 %v1170_v24, %v496_v40  ;;  %v644_v45 = vmul.f32 %v1170_v24, %v560_v41 }
  0xff   : > { %v700_v46 = vmax.f32 %v668_v36, 0.0  ;;  %v716_v47 = vmax.f32 %v684_v37, 0.0  ;;  %v669_v48 = vadd.f32 %v1175_v26, %v630_v38  ;;  %v685_v49 = vadd.f32 %v1175_v26, %v646_v39 }
 0x100   : > { %v698_v50 = vmax.f32 %v666_v42, 0.0  ;;  %v714_v51 = vmax.f32 %v682_v43, 0.0  ;;  %v667_v52 = vadd.f32 %v1175_v26, %v628_v44  ;;  %v683_v53 = vadd.f32 %v1175_v26, %v644_v45 }
 0x101   : > { %732 = vst [vmem:[%s1189_s24 + $0x10] sm:$0xff] %v700_v46  ;;  %748 = vst [vmem:[%s1189_s24 + $0x90] sm:$0xff] %v716_v47  ;;  %v701_v54 = vmax.f32 %v669_v48, 0.0  ;;  %v717_v55 = vmax.f32 %v685_v49, 0.0 }
 0x102   : > { %730 = vst [vmem:[%s1189_s24] sm:$0xff] %v698_v50  ;;  %746 = vst [vmem:[%s1189_s24 + $0x80] sm:$0xff] %v714_v51  ;;  %v699_v56 = vmax.f32 %v667_v52, 0.0  ;;  %v715_v57 = vmax.f32 %v683_v53, 0.0  ;;  %v962_v58 = vpop.f32.mrb[4].mxu0  ;;  %v978_v59 = vpop.f32.mrb[4].mxu1 }
 0x103   : > { %733 = vst [vmem:[%s1189_s24 + $0x18] sm:$0xff] %v701_v54  ;;  %749 = vst [vmem:[%s1189_s24 + $0x98] sm:$0xff] %v717_v55  ;;  %v633_v60 = vmul.f32 %v962_v58, %v1170_v24  ;;  %v649_v61 = vmul.f32 %v978_v59, %v1170_v24  ;;  %v509_v62 = vpop.f32.mrb[5].mxu0  ;;  %v573_v63 = vpop.f32.mrb[5].mxu1 }
 0x104   : > { %731 = vst [vmem:[%s1189_s24 + $0x8] sm:$0xff] %v699_v56  ;;  %747 = vst [vmem:[%s1189_s24 + $0x88] sm:$0xff] %v715_v57  ;;  %v631_v0 = vmul.f32 %v1170_v24, %v509_v62  ;;  %v647_v1 = vmul.f32 %v1170_v24, %v573_v63  ;;  %v963_v2 = vpop.f32.mrb[6].mxu0  ;;  %v979_v3 = vpop.f32.mrb[6].mxu1 }
 0x105   : > { %v672_v4 = vadd.f32 %v1175_v26, %v633_v60  ;;  %v688_v5 = vadd.f32 %v1175_v26, %v649_v61  ;;  %v634_v6 = vmul.f32 %v963_v2, %v1170_v24  ;;  %v650_v7 = vmul.f32 %v979_v3, %v1170_v24  ;;  %v512_v8 = vpop.f32.mrb[7].mxu0  ;;  %v576_v9 = vpop.f32.mrb[7].mxu1 }
 0x106   : > { %v670_v10 = vadd.f32 %v1175_v26, %v631_v0  ;;  %v686_v11 = vadd.f32 %v1175_v26, %v647_v1  ;;  %v632_v12 = vmul.f32 %v1170_v24, %v512_v8  ;;  %v648_v13 = vmul.f32 %v1170_v24, %v576_v9 }
 0x107   : > { %v704_v14 = vmax.f32 %v672_v4, 0.0  ;;  %v720_v15 = vmax.f32 %v688_v5, 0.0  ;;  %v673_v16 = vadd.f32 %v1175_v26, %v634_v6  ;;  %v689_v17 = vadd.f32 %v1175_v26, %v650_v7 }
 0x108   : > { %v702_v18 = vmax.f32 %v670_v10, 0.0  ;;  %v718_v19 = vmax.f32 %v686_v11, 0.0  ;;  %v671_v20 = vadd.f32 %v1175_v26, %v632_v12  ;;  %v687_v21 = vadd.f32 %v1175_v26, %v648_v13 }
 0x109   : > { %736 = vst [vmem:[%s1189_s24 + $0x30] sm:$0xff] %v704_v14  ;;  %752 = vst [vmem:[%s1189_s24 + $0xb0] sm:$0xff] %v720_v15  ;;  %v705_v22 = vmax.f32 %v673_v16, 0.0  ;;  %v721_v23 = vmax.f32 %v689_v17, 0.0 }
 0x10a   : > { %734 = vst [vmem:[%s1189_s24 + $0x20] sm:$0xff] %v702_v18  ;;  %750 = vst [vmem:[%s1189_s24 + $0xa0] sm:$0xff] %v718_v19  ;;  %v703_v25 = vmax.f32 %v671_v20, 0.0  ;;  %v719_v27 = vmax.f32 %v687_v21, 0.0  ;;  %v966_v28 = vpop.f32.mrb[8].mxu0  ;;  %v982_v29 = vpop.f32.mrb[8].mxu1 }
 0x10b   : > { %737 = vst [vmem:[%s1189_s24 + $0x38] sm:$0xff] %v705_v22  ;;  %753 = vst [vmem:[%s1189_s24 + $0xb8] sm:$0xff] %v721_v23  ;;  %v637_v30 = vmul.f32 %v966_v28, %v1170_v24  ;;  %v653_v31 = vmul.f32 %v982_v29, %v1170_v24  ;;  %v525_v32 = vpop.f32.mrb[9].mxu0  ;;  %v589_v33 = vpop.f32.mrb[9].mxu1 }
 0x10c   : > { %735 = vst [vmem:[%s1189_s24 + $0x28] sm:$0xff] %v703_v25  ;;  %751 = vst [vmem:[%s1189_s24 + $0xa8] sm:$0xff] %v719_v27  ;;  %v635_v34 = vmul.f32 %v1170_v24, %v525_v32  ;;  %v651_v35 = vmul.f32 %v1170_v24, %v589_v33  ;;  %v967_v36 = vpop.f32.mrb[10].mxu0  ;;  %v983_v37 = vpop.f32.mrb[10].mxu1 }
 0x10d   : > { %v676_v38 = vadd.f32 %v1175_v26, %v637_v30  ;;  %v692_v39 = vadd.f32 %v1175_v26, %v653_v31  ;;  %v638_v40 = vmul.f32 %v967_v36, %v1170_v24  ;;  %v654_v41 = vmul.f32 %v983_v37, %v1170_v24  ;;  %v528_v42 = vpop.f32.mrb[11].mxu0  ;;  %v592_v43 = vpop.f32.mrb[11].mxu1 }
 0x10e   : > { %v674_v44 = vadd.f32 %v1175_v26, %v635_v34  ;;  %v690_v45 = vadd.f32 %v1175_v26, %v651_v35  ;;  %v636_v46 = vmul.f32 %v1170_v24, %v528_v42  ;;  %v652_v47 = vmul.f32 %v1170_v24, %v592_v43 }
 0x10f   : > { %v708_v48 = vmax.f32 %v676_v38, 0.0  ;;  %v724_v49 = vmax.f32 %v692_v39, 0.0  ;;  %v677_v50 = vadd.f32 %v1175_v26, %v638_v40  ;;  %v693_v51 = vadd.f32 %v1175_v26, %v654_v41 }
 0x110   : > { %v706_v52 = vmax.f32 %v674_v44, 0.0  ;;  %v722_v53 = vmax.f32 %v690_v45, 0.0  ;;  %v675_v54 = vadd.f32 %v1175_v26, %v636_v46  ;;  %v691_v55 = vadd.f32 %v1175_v26, %v652_v47 }
 0x111   : > { %740 = vst [vmem:[%s1189_s24 + $0x50] sm:$0xff] %v708_v48  ;;  %756 = vst [vmem:[%s1189_s24 + $0xd0] sm:$0xff] %v724_v49  ;;  %v709_v56 = vmax.f32 %v677_v50, 0.0  ;;  %v725_v57 = vmax.f32 %v693_v51, 0.0 }
 0x112   : > { %738 = vst [vmem:[%s1189_s24 + $0x40] sm:$0xff] %v706_v52  ;;  %754 = vst [vmem:[%s1189_s24 + $0xc0] sm:$0xff] %v722_v53  ;;  %v707_v58 = vmax.f32 %v675_v54, 0.0  ;;  %v723_v59 = vmax.f32 %v691_v55, 0.0  ;;  %v970_v60 = vpop.f32.mrb[12].mxu0  ;;  %v986_v61 = vpop.f32.mrb[12].mxu1 }
 0x113   : > { %741 = vst [vmem:[%s1189_s24 + $0x58] sm:$0xff] %v709_v56  ;;  %757 = vst [vmem:[%s1189_s24 + $0xd8] sm:$0xff] %v725_v57  ;;  %v641_v62 = vmul.f32 %v970_v60, %v1170_v24  ;;  %v657_v63 = vmul.f32 %v986_v61, %v1170_v24  ;;  %v541_v0 = vpop.f32.mrb[13].mxu0  ;;  %v605_v1 = vpop.f32.mrb[13].mxu1 }
 0x114   : > { %739 = vst [vmem:[%s1189_s24 + $0x48] sm:$0xff] %v707_v58  ;;  %755 = vst [vmem:[%s1189_s24 + $0xc8] sm:$0xff] %v723_v59  ;;  %v639_v2 = vmul.f32 %v1170_v24, %v541_v0  ;;  %v655_v3 = vmul.f32 %v1170_v24, %v605_v1  ;;  %v971_v4 = vpop.f32.mrb[14].mxu0  ;;  %v987_v5 = vpop.f32.mrb[14].mxu1 }
 0x115   : > { %v680_v6 = vadd.f32 %v1175_v26, %v641_v62  ;;  %v696_v7 = vadd.f32 %v1175_v26, %v657_v63  ;;  %v642_v8 = vmul.f32 %v971_v4, %v1170_v24  ;;  %v658_v9 = vmul.f32 %v987_v5, %v1170_v24  ;;  %v544_v10 = vpop.f32.mrb[15].mxu0  ;;  %v608_v11 = vpop.f32.mrb[15].mxu1 }
 0x116   : > { %v678_v12 = vadd.f32 %v1175_v26, %v639_v2  ;;  %v694_v13 = vadd.f32 %v1175_v26, %v655_v3  ;;  %v640_v14 = vmul.f32 %v1170_v24, %v544_v10  ;;  %v656_v15 = vmul.f32 %v1170_v24, %v608_v11 }
 0x117   : > { %v712_v16 = vmax.f32 %v680_v6, 0.0  ;;  %v728_v17 = vmax.f32 %v696_v7, 0.0  ;;  %v681_v18 = vadd.f32 %v1175_v26, %v642_v8  ;;  %v697_v19 = vadd.f32 %v1175_v26, %v658_v9 }
 0x118   : > { %v710_v20 = vmax.f32 %v678_v12, 0.0  ;;  %v726_v21 = vmax.f32 %v694_v13, 0.0  ;;  %v679_v22 = vadd.f32 %v1175_v26, %v640_v14  ;;  %v695_v23 = vadd.f32 %v1175_v26, %v656_v15 }
 0x119   : > { %744 = vst [vmem:[%s1189_s24 + $0x70] sm:$0xff] %v712_v16  ;;  %760 = vst [vmem:[%s1189_s24 + $0xf0] sm:$0xff] %v728_v17  ;;  %v713_v25 = vmax.f32 %v681_v18, 0.0  ;;  %v729_v24 = vmax.f32 %v697_v19, 0.0 }
 0x11a   : > { %742 = vst [vmem:[%s1189_s24 + $0x60] sm:$0xff] %v710_v20  ;;  %758 = vst [vmem:[%s1189_s24 + $0xe0] sm:$0xff] %v726_v21  ;;  %v711_v27 = vmax.f32 %v679_v22, 0.0  ;;  %v727_v28 = vmax.f32 %v695_v23, 0.0 }
 0x11b   : > { %745 = vst [vmem:[%s1189_s24 + $0x78] sm:$0xff] %v713_v25  ;;  %761 = vst [vmem:[%s1189_s24 + $0xf8] sm:$0xff] %v729_v24 }
 0x11c   : > { %743 = vst [vmem:[%s1189_s24 + $0x68] sm:$0xff] %v711_v27  ;;  %759 = vst [vmem:[%s1189_s24 + $0xe8] sm:$0xff] %v727_v28 }
 0x11d PF: > { %s14_s17 = sadd.s32 1, %s1074_s17   ;;  %s1293_s15 = smov %s1070_s16 }
 0x11e   : > { %p11_p5 = scmp.ge.s32.totalorder %s14_s17, 4   ;;  %s1294_s16 = smov %s1296_s18 }
 0x120   :  { %13 = sbr.rel (!%p11_p5) target bundleno = 2 (0x2), region = 75 }

</bundles_post_ra>
